<compile_context>
chip_gen: v7x
topology: tpu7x:2x2x1
jax: 0.10.0
libtpu: 0.0.40
codegen_flags: <defaults>
</compile_context>

<pallas_src>
import functools

import jax
import jax.numpy as jnp
import numpy as np
from jax.experimental import pallas as pl
from jax.experimental.pallas import tpu as pltpu

_INT32_MAX = jnp.iinfo(jnp.int32).max
# Explicit scoped-VMEM cap: > v5e's 16 MiB default, == v6e/v7x default, well
# under v7x's 64 MiB physical VMEM.
_VMEM_LIMIT_BYTES = 32 * 1024 * 1024


# --------------------------------------------------------------------------
# Kernels
# --------------------------------------------------------------------------
def _fused_order_kernel(key_row_ref, order_ref, *, fold):
    """Single-block path (n <= fused_max): rank + scatter, lane-dense I/O.

    key_row_ref: (1, n) int32 packed keys (i on lanes)
    order_ref  : (1, n) int32, order[0, k] = original index of k-th box
    """
    n = key_row_ref.shape[1]
    key_row = key_row_ref[...]                       # key[i], i on lanes
    key_col = key_row.reshape(n, 1)                  # key[j], j on sublanes
    idx_col = jax.lax.broadcasted_iota(jnp.int32, (n, 1), 0)   # sublane index
    idx_row = jax.lax.broadcasted_iota(jnp.int32, (1, n), 1)   # lane index

    # precede[j, i] == True  <=>  box j strictly precedes box i.
    if fold:
        precede = key_col < key_row                  # tie-break folded in key
    else:
        precede = (key_col < key_row) | ((key_col == key_row) & (idx_col < idx_row))
    rank_row = jnp.sum(precede.astype(jnp.int32), axis=0, keepdims=True)  # (1, n)

    # Scatter: order[k] = i with rank[i] == k (i on sublanes, k on lanes).
    rank_col = rank_row.reshape(n, 1)                # tiny relayout (n int32)
    hit = rank_col == idx_row                        # hit[i, k]
    order_ref[...] = jnp.sum(jnp.where(hit, idx_col, 0), axis=0, keepdims=True)


def _rank_kernel(key_i_ref, key_j_ref, rank_ref, *, fold):
    """Tiled phase A: rank[i] = #boxes preceding box i, i on lanes.

    grid = (i_tiles, j_tiles); j (axis 1) is the reduction axis, the (1, T_OUT)
    rank block is revisited across it and used as the accumulator.
    """
    t_out = key_i_ref.shape[1]
    t_red = key_j_ref.shape[1]

    @pl.when(pl.program_id(1) == 0)
    def _init():
        rank_ref[...] = jnp.zeros_like(rank_ref)

    key_i = key_i_ref[...]                           # (1, t_out) lane-dense
    key_j = key_j_ref[...].reshape(t_red, 1)         # lanes->sublanes, O(t_red)
    if fold:
        precede = key_j < key_i                      # (t_red, t_out)
    else:
        ii = pl.program_id(0) * t_out + jax.lax.broadcasted_iota(
            jnp.int32, (1, t_out), 1)
        jj = pl.program_id(1) * t_red + jax.lax.broadcasted_iota(
            jnp.int32, (t_red, 1), 0)
        precede = (key_j < key_i) | ((key_j == key_i) & (jj < ii))
    rank_ref[...] += jnp.sum(precede.astype(jnp.int32), axis=0, keepdims=True)


def _scatter_kernel(rank_ref_in, order_ref):
    """Tiled phase B: order[k] = i such that rank[i] == k, k on lanes.

    grid = (k_tiles, i_tiles); i (axis 1) is the reduction axis, the (1, T_OUT)
    order block is revisited across it and used as the accumulator.
    """
    t_out = order_ref.shape[1]
    t_red = rank_ref_in.shape[1]

    @pl.when(pl.program_id(1) == 0)
    def _init():
        order_ref[...] = jnp.zeros_like(order_ref)

    rank_col = rank_ref_in[...].reshape(t_red, 1)    # lanes->sublanes, O(t_red)
    kk = pl.program_id(0) * t_out + jax.lax.broadcasted_iota(jnp.int32, (1, t_out), 1)
    ii = pl.program_id(1) * t_red + jax.lax.broadcasted_iota(jnp.int32, (t_red, 1), 0)
    hit = rank_col == kk                             # (t_red, t_out)
    order_ref[...] += jnp.sum(jnp.where(hit, ii, 0), axis=0, keepdims=True)


def _batched_page_kernel(rois_ref, order_ref):
    """Batched small-page path: key packing + rank + scatter, one page per step.

    rois_ref : (1, n, 4) float32
    order_ref: (1, 1, n) int32 (lane-dense row per page)
    """
    n = rois_ref.shape[1]
    r = rois_ref[0]                                                # (n, 4)
    # int() in the torch module truncates toward zero; so does f32->i32 convert.
    x2c = r[:, 0:1].astype(jnp.int32) + r[:, 2:3].astype(jnp.int32)  # 2*x_center
    y2c = r[:, 1:2].astype(jnp.int32) + r[:, 3:4].astype(jnp.int32)  # 2*y_center
    x_min = jnp.min(x2c, keepdims=True)
    x_rng = jnp.max(x2c, keepdims=True) - x_min + 1
    y_min = jnp.min(y2c, keepdims=True)
    key_col = (y2c - y_min) * x_rng + (x2c - x_min)                # (n, 1)
    key_row = key_col.reshape(1, n)

    idx_col = jax.lax.broadcasted_iota(jnp.int32, (n, 1), 0)
    idx_row = jax.lax.broadcasted_iota(jnp.int32, (1, n), 1)
    precede = (key_col < key_row) | ((key_col == key_row) & (idx_col < idx_row))
    rank_row = jnp.sum(precede.astype(jnp.int32), axis=0, keepdims=True)
    rank_col = rank_row.reshape(n, 1)
    hit = rank_col == idx_row
    order_ref[0] = jnp.sum(jnp.where(hit, idx_col, 0), axis=0, keepdims=True)


# --------------------------------------------------------------------------
# Wrappers
# --------------------------------------------------------------------------
def _pack_keys(rois, *, fold_index):
    """O(N) prologue: one int32 key per box, lexicographic in (y_c, x_c[, idx]).

    Returns (key, folded).  key is None if the base key cannot fit in int32
    (caller falls back).  Meant to be called eagerly (like the torch module);
    under jit the overflow guards cannot be evaluated and the safe tie-break
    path (folded=False) is used.
    """
    n = rois.shape[0]
    r = rois.astype(jnp.float32)
    x2c = r[:, 0].astype(jnp.int32) + r[:, 2].astype(jnp.int32)    # 2*x_center
    y2c = r[:, 1].astype(jnp.int32) + r[:, 3].astype(jnp.int32)    # 2*y_center
    try:
        x_min = int(x2c.min()); x_rng = int(x2c.max()) - x_min + 1
        y_min = int(y2c.min()); y_rng = int(y2c.max()) - y_min + 1
    except (jax.errors.ConcretizationTypeError,
            jax.errors.TracerIntegerConversionError):
        # Traced: no guards possible -> tie-break compare in the kernel.
        x_min = jnp.min(x2c); x_rng = jnp.max(x2c) - x_min + 1
        y_min = jnp.min(y2c)
        return (y2c - y_min) * x_rng + (x2c - x_min), False

    if y_rng * x_rng >= 2 ** 31:          # base key would overflow int32
        return None, False
    base = (y2c - y_min) * x_rng + (x2c - x_min)
    if fold_index and y_rng * x_rng * n < 2 ** 31:
        # Fold the index tie-break into the key: N^2 compare becomes one `<`.
        return base * n + jnp.arange(n, dtype=jnp.int32), True
    return base, False


def roi_sorter(rois: jax.Array, *, fused_max: int = 1024,
               tiles: tuple = (512, 2048), fold_index: bool = True) -> jax.Array:
    """Pallas equivalent of RoISorter.forward for one page: reading-order idx."""
    n = int(rois.shape[0])
    if n <= 1:
        return jnp.zeros((n,), jnp.int32)

    key, folded = _pack_keys(rois, fold_index=fold_index)
    if key is None:
        # Pathological coordinate range: packed key would overflow int32.
        # TODO(synk): add a two-key (y, x) Pallas kernel variant for this case.
        r = rois.astype(jnp.float32)
        x2c = r[:, 0].astype(jnp.int32) + r[:, 2].astype(jnp.int32)
        y2c = r[:, 1].astype(jnp.int32) + r[:, 3].astype(jnp.int32)
        return jnp.lexsort((jnp.arange(n), x2c, y2c)).astype(jnp.int32)

    if n <= fused_max:
        # Single-block fused kernel (one dispatch), lane-dense (1, n) in/out.
        # fused_max defaults to 1024 so the (n, n) transient stays well inside
        # v7x's smaller VMEM.
        order_row = pl.pallas_call(
            functools.partial(_fused_order_kernel, fold=folded),
            out_shape=jax.ShapeDtypeStruct((1, n), jnp.int32),
            in_specs=[pl.BlockSpec((1, n), lambda: (0, 0))],
            out_specs=pl.BlockSpec((1, n), lambda: (0, 0)),
            compiler_params=pltpu.CompilerParams(
                vmem_limit_bytes=_VMEM_LIMIT_BYTES),
        )(key.reshape(1, n))
        return order_row.reshape(n)

    # ---------------- tiled two-phase path (large N) ----------------
    t_out, t_red = tiles
    assert t_out % 128 == 0, "output tile must be a multiple of 128"
    assert t_red % t_out == 0, "reduction tile must be a multiple of output tile"
    np_out = -(-n // t_out) * t_out
    t_red = min(t_red, np_out)              # don't over-tile small problems
    np_ = -(-np_out // t_red) * t_red       # common multiple of both tiles
    pad = np_ - n
    if pad:
        # Padded boxes get key = INT32_MAX (> any real key), so they rank after
        # all real boxes and never pollute real ranks / the real scatter slots.
        key = jnp.concatenate(
            [key, jnp.full((pad,), _INT32_MAX, dtype=jnp.int32)])
    key_row = key.reshape(1, np_)
    nt_out = np_ // t_out
    nt_red = np_ // t_red

    # Phase A: rank[i] = #predecessors, emitted as a lane-dense (1, Np) row.
    rank_row = pl.pallas_call(
        functools.partial(_rank_kernel, fold=folded),
        out_shape=jax.ShapeDtypeStruct((1, np_), jnp.int32),
        grid=(nt_out, nt_red),
        in_specs=[pl.BlockSpec((1, t_out), lambda i, j: (0, i)),
                  pl.BlockSpec((1, t_red), lambda i, j: (0, j))],
        out_specs=pl.BlockSpec((1, t_out), lambda i, j: (0, i)),
        compiler_params=pltpu.CompilerParams(
            dimension_semantics=("parallel", "arbitrary"),
            vmem_limit_bytes=_VMEM_LIMIT_BYTES),
    )(key_row, key_row)

    # Phase B: order[k] = i with rank[i] == k; consumes/emits (1, Np) rows.
    order_row = pl.pallas_call(
        _scatter_kernel,
        out_shape=jax.ShapeDtypeStruct((1, np_), jnp.int32),
        grid=(nt_out, nt_red),
        in_specs=[pl.BlockSpec((1, t_red), lambda k, i: (0, i))],
        out_specs=pl.BlockSpec((1, t_out), lambda k, i: (0, k)),
        compiler_params=pltpu.CompilerParams(
            dimension_semantics=("parallel", "arbitrary"),
            vmem_limit_bytes=_VMEM_LIMIT_BYTES),
    )(rank_row)

    return order_row[0, :n]


def roi_sorter_batched(rois: jax.Array) -> jax.Array:
    """Batched small-page path: rois (B, N, 4) -> orders (B, N), one pallas_call.

    Key packing is fused into the kernel and pages shard across the leading
    "parallel" grid axis (both v7x TensorCores).  All pages must share N.
    """
    # TODO(synk): ragged batches (per-page ROI counts) need sentinel padding.
    b, n, _ = rois.shape
    order = pl.pallas_call(
        _batched_page_kernel,
        out_shape=jax.ShapeDtypeStruct((b, 1, n), jnp.int32),
        grid=(b,),
        in_specs=[pl.BlockSpec((1, n, 4), lambda p: (p, 0, 0))],
        out_specs=pl.BlockSpec((1, 1, n), lambda p: (p, 0, 0)),
        compiler_params=pltpu.CompilerParams(
            dimension_semantics=("parallel",),
            vmem_limit_bytes=_VMEM_LIMIT_BYTES),
    )(rois.astype(jnp.float32))
    return order.reshape(b, n)


# --------------------------------------------------------------------------
# Reference + self-test
# --------------------------------------------------------------------------
def _reference_order(rois_np: np.ndarray) -> np.ndarray:
    """Pure-numpy reference of the same lexicographic reading order."""
    r = np.trunc(rois_np.astype(np.float64))
    xc = r[:, 0] + r[:, 2]   # 2 * x_center (order-equivalent)
    yc = r[:, 1] + r[:, 3]   # 2 * y_center
    # lexsort: last key is primary -> sort by yc, then xc, then index.
    return np.lexsort((np.arange(r.shape[0]), xc, yc)).astype(np.int32)


if __name__ == "__main__":
    root = jax.random.PRNGKey(0)
    k1, k2, k3, k4, k5, k6 = jax.random.split(root, 6)

    # Test 1: documented workload -- a batch of small pages, one pallas_call.
    B, N = 2, 8
    xy1 = jax.random.uniform(k1, (B, N, 2), minval=0.0, maxval=1000.0)
    wh = jax.random.uniform(k2, (B, N, 2), minval=20.0, maxval=120.0)
    rois_b = jnp.concatenate([xy1, xy1 + wh], axis=-1).astype(jnp.float32)
    orders_b = jax.block_until_ready(roi_sorter_batched(rois_b))
    for p in range(B):
        ref = _reference_order(np.asarray(rois_b[p]))
        assert np.array_equal(np.asarray(orders_b[p]), ref), (p, orders_b[p], ref)

    # Test 2: single-page fused path (folded single-compare key).
    n1 = 32
    xy1s = jax.random.uniform(k3, (n1, 2), minval=0.0, maxval=1100.0)
    whs = jax.random.uniform(k4, (n1, 2), minval=10.0, maxval=90.0)
    rois1 = jnp.concatenate([xy1s, xy1s + whs], axis=1).astype(jnp.float32)
    o1 = jax.block_until_ready(roi_sorter(rois1))
    ref1 = _reference_order(np.asarray(rois1))
    assert np.array_equal(np.asarray(o1), ref1), (o1, ref1)

    # Test 3: tiled two-phase path with padding (small tiles so shapes stay
    # tiny), folded single-compare key.
    n2 = 300
    xy1b = jax.random.uniform(k5, (n2, 2), minval=0.0, maxval=1100.0)
    whb = jax.random.uniform(k6, (n2, 2), minval=10.0, maxval=90.0)
    rois2 = jnp.concatenate([xy1b, xy1b + whb], axis=1).astype(jnp.float32)
    o2 = jax.block_until_ready(roi_sorter(rois2, fused_max=0, tiles=(128, 256)))
    ref2 = _reference_order(np.asarray(rois2))
    assert np.array_equal(np.asarray(o2), ref2), (o2, ref2)

    # Test 4: tiled path, tie-break (no index fold) kernel variant.
    o3 = jax.block_until_ready(
        roi_sorter(rois2, fused_max=0, tiles=(128, 256), fold_index=False))
    assert np.array_equal(np.asarray(o3), ref2), (o3, ref2)

    print("KERNEL_OK")
</pallas_src>

<mosaic_0001>
module attributes {stable_mosaic.version = 11 : i64} {
  func.func @_batched_page_kernel(%arg0: i32, %arg1: memref<1x8x4xf32, #tpu.memory_space<vmem>>, %arg2: memref<1x1x8xi32, #tpu.memory_space<vmem>>) attributes {dimension_semantics = [#tpu.dimension_semantics<parallel>], iteration_bounds = array<i64: 2>, scalar_prefetch = 0 : i64, scratch_operands = 0 : i64, tpu.core_type = #tpu.core_type<tc>, window_params = [{transform_indices = @transform_0, window_bounds = array<i64: 1, 8, 4>}, {transform_indices = @transform_1, window_bounds = array<i64: 1, 1, 8>}]} {
    %c0 = arith.constant 0 : index
    %c0_0 = arith.constant 0 : index
    %c0_1 = arith.constant 0 : index
    %0 = vector.load %arg1[%c0, %c0_0, %c0_1] : memref<1x8x4xf32, #tpu.memory_space<vmem>>, vector<1x8x4xf32>
    %1 = vector.shape_cast %0 : vector<1x8x4xf32> to vector<8x4xf32>
    %2 = vector.extract_strided_slice %1 {offsets = [0, 0], sizes = [8, 1], strides = [1, 1]} : vector<8x4xf32> to vector<8x1xf32>
    %3 = arith.fptosi %2 : vector<8x1xf32> to vector<8x1xi32>
    %4 = vector.extract_strided_slice %1 {offsets = [0, 2], sizes = [8, 1], strides = [1, 1]} : vector<8x4xf32> to vector<8x1xf32>
    %5 = arith.fptosi %4 : vector<8x1xf32> to vector<8x1xi32>
    %6 = arith.addi %3, %5 : vector<8x1xi32>
    %7 = vector.extract_strided_slice %1 {offsets = [0, 1], sizes = [8, 1], strides = [1, 1]} : vector<8x4xf32> to vector<8x1xf32>
    %8 = arith.fptosi %7 : vector<8x1xf32> to vector<8x1xi32>
    %9 = vector.extract_strided_slice %1 {offsets = [0, 3], sizes = [8, 1], strides = [1, 1]} : vector<8x4xf32> to vector<8x1xf32>
    %10 = arith.fptosi %9 : vector<8x1xf32> to vector<8x1xi32>
    %11 = arith.addi %8, %10 : vector<8x1xi32>
    %12 = vector.shape_cast %6 : vector<8x1xi32> to vector<1x8x1xi32>
    %cst = arith.constant dense<2147483647> : vector<1xi32>
    %13 = vector.multi_reduction <minsi>, %12, %cst [1, 2] : vector<1x8x1xi32> to vector<1xi32>
    %14 = vector.shape_cast %13 : vector<1xi32> to vector<1x1x1xi32>
    %15 = vector.extract %14[0, 0, 0] : i32 from vector<1x1x1xi32>
    %16 = vector.broadcast %15 : i32 to vector<1x1xi32>
    %17 = vector.shape_cast %6 : vector<8x1xi32> to vector<1x8x1xi32>
    %cst_2 = arith.constant dense<-2147483648> : vector<1xi32>
    %18 = vector.multi_reduction <maxsi>, %17, %cst_2 [1, 2] : vector<1x8x1xi32> to vector<1xi32>
    %19 = vector.shape_cast %18 : vector<1xi32> to vector<1x1x1xi32>
    %20 = vector.extract %19[0, 0, 0] : i32 from vector<1x1x1xi32>
    %21 = vector.broadcast %20 : i32 to vector<1x1xi32>
    %22 = arith.subi %21, %16 : vector<1x1xi32>
    %c1_i32 = arith.constant 1 : i32
    %23 = vector.broadcast %c1_i32 : i32 to vector<1x1xi32>
    %24 = arith.addi %22, %23 : vector<1x1xi32>
    %25 = vector.shape_cast %11 : vector<8x1xi32> to vector<1x8x1xi32>
    %cst_3 = arith.constant dense<2147483647> : vector<1xi32>
    %26 = vector.multi_reduction <minsi>, %25, %cst_3 [1, 2] : vector<1x8x1xi32> to vector<1xi32>
    %27 = vector.shape_cast %26 : vector<1xi32> to vector<1x1x1xi32>
    %28 = vector.extract %27[0, 0, 0] : i32 from vector<1x1x1xi32>
    %29 = vector.broadcast %28 : i32 to vector<1x1xi32>
    %30 = vector.broadcast %29 : vector<1x1xi32> to vector<8x1xi32>
    %31 = arith.subi %11, %30 : vector<8x1xi32>
    %32 = vector.broadcast %24 : vector<1x1xi32> to vector<8x1xi32>
    %33 = arith.muli %31, %32 : vector<8x1xi32>
    %34 = vector.broadcast %16 : vector<1x1xi32> to vector<8x1xi32>
    %35 = arith.subi %6, %34 : vector<8x1xi32>
    %36 = arith.addi %33, %35 : vector<8x1xi32>
    %37 = vector.shape_cast %36 : vector<8x1xi32> to vector<1x8xi32>
    %38 = tpu.iota {dimensions = array<i32: 0>} : vector<8x1xi32>
    %39 = tpu.iota {dimensions = array<i32: 1>} : vector<1x8xi32>
    %40 = vector.broadcast %36 : vector<8x1xi32> to vector<8x8xi32>
    %41 = vector.broadcast %37 : vector<1x8xi32> to vector<8x8xi32>
    %42 = arith.cmpi slt, %40, %41 : vector<8x8xi32>
    %43 = vector.broadcast %36 : vector<8x1xi32> to vector<8x8xi32>
    %44 = vector.broadcast %37 : vector<1x8xi32> to vector<8x8xi32>
    %45 = arith.cmpi eq, %43, %44 : vector<8x8xi32>
    %46 = vector.broadcast %38 : vector<8x1xi32> to vector<8x8xi32>
    %47 = vector.broadcast %39 : vector<1x8xi32> to vector<8x8xi32>
    %48 = arith.cmpi slt, %46, %47 : vector<8x8xi32>
    %49 = arith.andi %45, %48 : vector<8x8xi1>
    %50 = arith.ori %42, %49 : vector<8x8xi1>
    %51 = arith.extui %50 : vector<8x8xi1> to vector<8x8xi32>
    %cst_4 = arith.constant dense<0> : vector<8xi32>
    %52 = vector.multi_reduction <add>, %51, %cst_4 [0] : vector<8x8xi32> to vector<8xi32>
    %53 = vector.shape_cast %52 : vector<8xi32> to vector<1x8xi32>
    %54 = vector.shape_cast %53 : vector<1x8xi32> to vector<8x1xi32>
    %55 = vector.broadcast %54 : vector<8x1xi32> to vector<8x8xi32>
    %56 = vector.broadcast %39 : vector<1x8xi32> to vector<8x8xi32>
    %57 = arith.cmpi eq, %55, %56 : vector<8x8xi32>
    %c0_i32 = arith.constant 0 : i32
    %58 = vector.shape_cast %38 : vector<8x1xi32> to vector<8x1xi32>
    %59 = vector.broadcast %58 : vector<8x1xi32> to vector<8x8xi32>
    %60 = vector.broadcast %c0_i32 : i32 to vector<8x8xi32>
    %61 = arith.select %57, %59, %60 : vector<8x8xi1>, vector<8x8xi32>
    %cst_5 = arith.constant dense<0> : vector<8xi32>
    %62 = vector.multi_reduction <add>, %61, %cst_5 [0] : vector<8x8xi32> to vector<8xi32>
    %63 = vector.shape_cast %62 : vector<8xi32> to vector<1x8xi32>
    %c0_6 = arith.constant 0 : index
    %c0_7 = arith.constant 0 : index
    %c0_8 = arith.constant 0 : index
    %64 = vector.load %arg2[%c0_6, %c0_7, %c0_8] : memref<1x1x8xi32, #tpu.memory_space<vmem>>, vector<1x1x8xi32>
    %65 = vector.shape_cast %64 : vector<1x1x8xi32> to vector<1x8xi32>
    %66 = vector.shape_cast %63 : vector<1x8xi32> to vector<1x1x8xi32>
    tpu.vector_store %arg2[%c0_6, %c0_7, %c0_8], %66 {strides = array<i32>} : memref<1x1x8xi32, #tpu.memory_space<vmem>>, vector<1x1x8xi32>,
    return
  }
  func.func @transform_0(%arg0: i32) -> (i32, i32, i32) {
    %c0_i32 = arith.constant 0 : i32
    %c0_i32_0 = arith.constant 0 : i32
    %c0_i32_1 = arith.constant 0 : i32
    return %arg0, %c0_i32, %c0_i32_0 : i32, i32, i32
  }
  func.func @transform_1(%arg0: i32) -> (i32, i32, i32) {
    %c0_i32 = arith.constant 0 : i32
    %c0_i32_0 = arith.constant 0 : i32
    %c0_i32_1 = arith.constant 0 : i32
    return %arg0, %c0_i32, %c0_i32_0 : i32, i32, i32
  }
}

</mosaic_0001>

<bundles_post_ra>
// kernel: tpu_custom_call.1
= control target key start
LH: loop header
LB: loop body
LE: loop exit
PB: predicated region body
PF: predicated region fallthrough
CT: control target
= control target key end

     0   :  { %6 = vsyncpa [#allocation3], 0  ;;  %s571_s0 = inlined_call_operand.vmem [shape: f32[2,8,4], index: 0, kind: input, shape index: {}]   ;;  %s572_s1 = inlined_call_operand.hbm [shape: s32[2,1,8], index: 1, kind: output, shape index: {}]  }
   0x1   :  { %8 = vsyncpa [#allocation3 + $0x1], 0  ;;  %s462_s6 = smov 0   ;;  %s464_s7 = smov 0  }
   0x2   :  { %s466_s8 = smov 0   ;;  %s468_s9 = smov 0  }
   0x3 LB: > { %s483_s10 = sadd.s32 4294967295, %s445_s9   ;;  %s323_s11 = sadd.s32 4294967294, %s445_s9   ;;  %s445_s9 = sphi %s468_s9, %s578_s9   ;;  %s441_s8 = sphi %s466_s8, %s577_s8   ;;  %s437_s7 = sphi %s464_s7, %s576_s7   ;;  %s433_s6 = sphi %s462_s6, %s575_s6  }
   0x4   : > { %s487_s12 = sadd.s32 1, %s445_s9   ;;  %s47_s13 = sadd.s32 1, %s441_s8 }
   0x5   : > { %s44_s14 = ssub.s32 %s445_s9, %s487_s12  ;;  %p57_p0 = scmp.ne.s32.totalorder %s441_s8, %s437_s7 }
   0x6   : > { %p45_p1 = scmp.eq.s32.totalorder %s44_s14, 0  ;;  %p58_p2 = scmp.eq.s32.totalorder %s483_s10, 1 }
   0x7   : > { %p63_p3 = scmp.ne.s32.totalorder %s437_s7, %s433_s6  ;;  %p64_p4 = scmp.eq.s32.totalorder %s323_s11, 1 }
   0x8   : > { %s498_s15 = scalar_select %p45_p1, %s441_s8, %s47_s13  }
   0x9   : > { %p500_p5 = por %p58_p2, %p57_p0  ;;  %p504_p6 = por %p64_p4, %p63_p3 }
   0xa   : > { %p326_p7 = scmp.ge.s32.totalorder %s445_s9, 1  ;;  %p89_p8 = scmp.lt.s32.totalorder %s445_s9, 3 }
   0xc   : > { %p90_p9 = pnand %p326_p7, %p89_p8 }
   0xd   : > { %p107_p10 = scmp.lt.s32.totalorder (!%p90_p9), %s483_s10, 1  ;;  %s447_s23 = smov (!%p90_p9), 126   ;;  %vm116_vm0 = vcmask (!%p90_p9), 7168   ;;  %vm171_vm1 = vcmask (!%p90_p9), 15368   ;;  %v448_v59 = vmov (!%p90_p9), 1  }
   0xe   : > { %93 = sbr.rel (%p90_p9) target bundleno = 915 (0x393), region = 24  ;;  %382 = vset.pattern.permute.xlu0 (!%p90_p9), %v448_v59  ;;  %s449_s25 = smov (!%p90_p9), 1  }
   0xf   : > { %s105_s28 = sand.u32 (!%p90_p9), 1, %s437_s7   ;;  %s328_s29 = sshll.u32 (!%p90_p9), %s483_s10, 4 }
  0x10   : > { %s106_s30 = scalar_lea.vmem (!%p90_p9), [#allocation2], %s105_s28  ;;  %s529_s5 = scalar_lea.hbm (!%p90_p9), %s572_s1, %s328_s29 }
  0x11   : > { %s268_s2 = sshll.u32 (!%p90_p9), %s106_s30, 4  ;;  %s256_s11 = scalar_lea.sflag (!%p90_p9), [#allocation3], %s105_s28  ;;  %s531_s2 = int_to_ptr.vmem [resolvable:$true] %s268_s2 }
  0x12   : > { %s383_s13 = scalar_lea.vmem (!%p90_p9), %s531_s2, 16 }
  0x13   : > { %p384_p11 = scmp.ne.s32.totalorder (!%p90_p9), %s531_s2, %s383_s13 }
  0x15   : > { %s108_s18 = scalar_select %p107_p10, %s483_s10, 1 }
  0x16   : > { %p385_p12 = pnand %p384_p11, %p500_p5  ;;  %s451_s10 = smov [#allocation2]  }
  0x17   : > { %s327_s19 = sshll.u32 %s108_s18, 3  ;;  %s387_s14 = sshll.u32 %s451_s10, 4  ;;  %s388_s14 = int_to_ptr.vmem [resolvable:$false] %s387_s14 }
  0x18   : > { %s110_s22 = scalar_lea.vmem %s571_s0, %s327_s19  ;;  %p386_p13 = pneg %p385_p12 }
  0x19   : > { %v111_v0 = vld [vmem:[%s110_s22] sm:$0xff]  ;;  %s389_s18 = scalar_lea.vmem %s388_s14, 32  ;;  %p390_p0 = scmp.lt.s32.totalorder %s531_s2, %s388_s14 }
  0x1a   : > { %v331_v1 = vtrunc.f32 %v111_v0  ;;  %p391_p1 = scmp.lt.s32.totalorder %s389_s18, %s383_s13 }
  0x1c   : > { %v332_v2 = vcvt.f32.s32 %v331_v1  ;;  %p392_p2 = por %p391_p1, %p390_p0 }
  0x1e   : > { %113 = vrot.lane.b32.xlu0 %v332_v2, %s447_s23  ;;  %p393_p3 = pnand %p392_p2, %p386_p13 }
  0x90   : > { %v114_v3 = vpop.permute.xlu0 %113 }
  0x91   : > { %v515_v4 = vadd.s32 %v332_v2, %v114_v3 }
  0x93   : > { %v143_v5 = vsel %vm116_vm0, %v515_v4, 2147483648  ;;  %v117_v6 = vsel %vm116_vm0, %v515_v4, 2147483647  ;;  %v172_v7 = vsel %vm171_vm1, %v515_v4, 2147483647  ;;  %vm233_vm1 = vcmask 64512  }
  0x94   : > { %v145_v8 = vshra.s32 %v143_v5, 16  ;;  %v119_v9 = vshra.s32 %v117_v6, 16  ;;  %v174_v12 = vshra.s32 %v172_v7, 16  ;;  %v118_v14 = vand.u32 65535, %v117_v6 }
  0x95   : > { %v144_v18 = vand.u32 65535, %v143_v5  ;;  %v173_v22 = vand.u32 65535, %v172_v7  ;;  %v204_v7 = vlaneseq }
  0x96   : > { %v147_v10 = vcvt.s32.f32 %v145_v8  ;;  %v121_v11 = vcvt.s32.f32 %v119_v9  ;;  %v176_v13 = vcvt.s32.f32 %v174_v12  ;;  %v120_v17 = vcvt.s32.f32 %v118_v14 }
  0x97   : > { %v146_v21 = vcvt.s32.f32 %v144_v18  ;;  %v175_v24 = vcvt.s32.f32 %v173_v22  ;;  %v205_v8 = vshrl.u32 %v204_v7, 7  ;;  %v207_v9 = vand.u32 127, %v204_v7 }
  0x98   : > { %148 = vmax.xlane.f32.xlu1 %v147_v10  ;;  %122 = vmin.xlane.f32.xlu0 %v121_v11 }
  0x99   : > { %vm229_vm14 = vcmp.lt.s32.totalorder %v205_v8, %v207_v9 }
  0x9c   : > { %177 = vmin.xlane.f32.xlu1 %v176_v13 }
 0x125   : > { %v149_v15 = vpop.xlane.xlu1 %148  ;;  %v123_v16 = vpop.xlane.xlu0 %122 }
 0x126   : > { %vm124_vm2 = vcmp.eq.f32.partialorder %v121_v11, %v123_v16  ;;  %vm150_vm3 = vcmp.eq.f32.partialorder %v147_v10, %v149_v15  ;;  %v129_v26 = vcvt.f32.s32 %v123_v16  ;;  %v155_v28 = vcvt.f32.s32 %v149_v15 }
 0x127   : > { %v125_v19 = vsel %vm124_vm2, %v120_v17, inf  ;;  %v151_v23 = vsel %vm150_vm3, %v146_v21, -inf  ;;  %v213_v10 = vsub.s32 %v207_v9, %v205_v8 }
 0x128   : > { %126 = vmin.xlane.f32.xlu1 %v125_v19  ;;  %v130_v29 = vshll.u32 %v129_v26, 16  ;;  %v156_v33 = vshll.u32 %v155_v28, 16 }
 0x129   : > { %v178_v20 = vpop.xlane.xlu1 %177 }
 0x12a   : > { %vm179_vm4 = vcmp.eq.f32.partialorder %v176_v13, %v178_v20  ;;  %v184_v34 = vcvt.f32.s32 %v178_v20  ;;  %v450_v13 = vmov 0  }
 0x12b   : > { %v180_v25 = vsel %vm179_vm4, %v175_v24, inf }
 0x12c   : > { %152 = vmax.xlane.f32.xlu1 %v151_v23  ;;  %v185_v40 = vshll.u32 %v184_v34, 16 }
 0x130   : > { %181 = vmin.xlane.f32.xlu1 %v180_v25 }
 0x1b5   : > { %v127_v27 = vpop.xlane.xlu1 %126 }
 0x1b6   : > { %v128_v30 = vcvt.f32.s32 %v127_v27 }
 0x1b8   : > { %v131_v31 = vadd.s32 %v130_v29, %v128_v30 }
 0x1b9   : > { %v153_v32 = vpop.xlane.xlu1 %152 }
 0x1ba   : > { %v132_v35 = vrot.slane %v131_v31, 4  ;;  %v154_v36 = vcvt.f32.s32 %v153_v32 }
 0x1bc   : > { %v157_v37 = vadd.s32 %v156_v33, %v154_v36  ;;  %vm133_vm5 = vcmp.lt.s32.totalorder %v131_v31, %v132_v35 }
 0x1bd   : > { %v182_v38 = vpop.xlane.xlu1 %181  ;;  %v134_v39 = vsel %vm133_vm5, %v131_v31, %v132_v35  ;;  %vm253_vm5 = vcmask 57344  }
 0x1be   : > { %v158_v41 = vrot.slane %v157_v37, 4  ;;  %v183_v42 = vcvt.f32.s32 %v182_v38  ;;  %v135_v43 = vrot.slane %v134_v39, 2 }
 0x1c0   : > { %vm159_vm6 = vcmp.gt.s32.totalorder %v157_v37, %v158_v41  ;;  %v186_v44 = vadd.s32 %v185_v40, %v183_v42  ;;  %vm136_vm7 = vcmp.lt.s32.totalorder %v134_v39, %v135_v43 }
 0x1c1   : > { %v137_v45 = vsel %vm136_vm7, %v134_v39, %v135_v43  ;;  %v160_v46 = vsel %vm159_vm6, %v157_v37, %v158_v41 }
 0x1c2   : > { %v187_v47 = vrot.slane %v186_v44, 4  ;;  %v138_v48 = vrot.slane %v137_v45, 1  ;;  %v161_v49 = vrot.slane %v160_v46, 2 }
 0x1c4   : > { %vm188_vm8 = vcmp.lt.s32.totalorder %v186_v44, %v187_v47  ;;  %vm139_vm9 = vcmp.lt.s32.totalorder %v137_v45, %v138_v48  ;;  %vm162_vm10 = vcmp.gt.s32.totalorder %v160_v46, %v161_v49 }
 0x1c5   : > { %v140_v50 = vsel %vm139_vm9, %v137_v45, %v138_v48  ;;  %v163_v51 = vsel %vm162_vm10, %v160_v46, %v161_v49  ;;  %v189_v52 = vsel %vm188_vm8, %v186_v44, %v187_v47 }
 0x1c6   : > { %333 = vpush %v140_v50  ;;  %v164_v53 = vrot.slane %v163_v51, 1  ;;  %v190_v54 = vrot.slane %v189_v52, 2 }
 0x1c8   : > { %vm165_vm11 = vcmp.gt.s32.totalorder %v163_v51, %v164_v53  ;;  %vm191_vm12 = vcmp.lt.s32.totalorder %v189_v52, %v190_v54 }
 0x1c9   : > { %v166_v55 = vsel %vm165_vm11, %v163_v51, %v164_v53  ;;  %v192_v56 = vsel %vm191_vm12, %v189_v52, %v190_v54 }
 0x1ca   : > { %335 = vpush %v166_v55  ;;  %v193_v57 = vrot.slane %v192_v56, 1 }
 0x1cc   : > { %vm194_vm13 = vcmp.lt.s32.totalorder %v192_v56, %v193_v57 }
 0x1cd   : > { %v195_v58 = vsel %vm194_vm13, %v192_v56, %v193_v57 }
 0x1ce   : > { %337 = vpush %v195_v58 }
 0x1f7   : > { %s334_s24 = spop %333 }
 0x1f8   : > { %v142_v60 = vstv %s334_s24 }
 0x1f9   : > { %v200_v61 = vsub.s32 %v515_v4, %v142_v60 }
 0x1fb   : > { %201 = vrot.lane.b32.xlu1 %v200_v61, %s449_s25  ;;  %s336_s26 = spop %335 }
 0x1fc   : > { %v168_v62 = vstv %s336_s26 }
 0x1fd   : > { %v169_v0 = vsub.s32 %v168_v62, %v142_v60 }
 0x1ff   : > { %s338_s27 = spop %337  ;;  %v170_v2 = vadd.s32 1, %v169_v0 }
 0x200   : > { %v197_v63 = vstv %s338_s27 }
 0x201   : > { %v198_v1 = vsub.s32 %v515_v4, %v197_v63 }
 0x203   : > { %v199_v3 = vmul.u32 %v198_v1, %v170_v2 }
 0x26d   : > { %v202_v5 = vpop.permute.xlu1 %201 }
 0x26e   : > { %v203_v6 = vadd.s32 %v202_v5, %v199_v3 }
 0x270   : > { %209 = vperm.xlu0 %382, %v203_v6  }
 0x2ef   : > { %v210_v11 = vpop.permute.xlu0 %209 }
 0x2f0   : > { %v214_v12 = vrot.slane %v210_v11, %v213_v10 }
 0x2f2   : > { %vm227_vm15 = vcmp.lt.s32.totalorder %v210_v11, %v214_v12  ;;  %vm228_vm0 = vcmp.eq.s32.totalorder %v210_v11, %v214_v12 }
 0x2f3   : > { %vm230_vm2 = vmand %vm228_vm0, %vm229_vm14 }
 0x2f4   : > { %vm231_vm3 = vmor %vm227_vm15, %vm230_vm2 }
 0x2f5   : > { %v232_v4 = vsel %vm231_vm3, 1, %v450_v13 }
 0x2f6   : > { %v234_v14 = vsel %vm233_vm1, %v232_v4, 0 }
 0x2f7   : > { %v235_v15 = vrot.slane %v234_v14, 4 }
 0x2f9   : > { %v236_v16 = vadd.s32 %v235_v15, %v234_v14 }
 0x2fb   : > { %v237_v17 = vrot.slane %v236_v16, 2 }
 0x2fd   : > { %v238_v18 = vadd.s32 %v237_v17, %v236_v16 }
 0x2ff   : > { %v239_v19 = vrot.slane %v238_v18, 1 }
 0x301   : > { %v240_v20 = vadd.s32 %v239_v19, %v238_v18 }
 0x303   : > { %242 = vbcast.lane.b32.xlu1 %v240_v20, 256 }
 0x375   : > { %v243_v21 = vpop.permute.xlu1 %242 }
 0x376   : > { %vm244_vm4 = vcmp.eq.s32.totalorder %v243_v21, %v207_v9 }
 0x377   : > { %v245_v22 = vsel %vm244_vm4, %v205_v8, 0 }
 0x378   : > { %v246_v23 = vsel %vm233_vm1, %v245_v22, 0 }
 0x379   : > { %v247_v24 = vrot.slane %v246_v23, 4 }
 0x37b   : > { %v248_v25 = vadd.s32 %v247_v24, %v246_v23 }
 0x37d   : > { %v249_v26 = vrot.slane %v248_v25, 2 }
 0x37f   : > { %v250_v27 = vadd.s32 %v249_v26, %v248_v25 }
 0x381   : > { %v251_v28 = vrot.slane %v250_v27, 1 }
 0x383   : > { %v252_v29 = vadd.s32 %v251_v28, %v250_v27 }
 0x385   : > { %254 = vst.msk [vmem:[%s106_s30] sm:$0x1] %vm253_vm5, %v252_v29 }
 0x386   : > { %396 = shalt.err (!%p393_p3)
}
 0x387   : > { %s397_s19 = scalar_lea.hbm %s529_s5, 16  ;;  %s401_s22 = scalar_lea.hbm %s572_s1, 32 }
 0x388   : > { %p398_p4 = scmp.ne.s32.totalorder %s529_s5, %s397_s19  ;;  %p402_p9 = scmp.lt.u32.totalorder %s529_s5, %s572_s1 }
 0x389   : > { %p403_p10 = scmp.lt.u32.totalorder %s401_s22, %s397_s19  ;;  %p405_p12 = scmp.lt.u32.totalorder %s397_s19, %s529_s5 }
 0x38a   : > { %p399_p7 = pnand %p398_p4, %p500_p5 }
 0x38b   : > { %p404_p11 = por %p403_p10, %p402_p9 }
 0x38c   : > { %p400_p8 = pneg %p399_p7 }
 0x38d   : > { %p406_p13 = por %p405_p12, %p404_p11 }
 0x38f   : > { %p407_p0 = pnand %p406_p13, %p400_p8 }
 0x391   : > { %410 = shalt.err (!%p407_p0)
}
 0x392   : > { %339 = dma.vmem_to_hbm [thread:$0]  (%p500_p5), %s531_s2, 16, %s529_s5, %s256_s11  }
 0x393 PF: > { %p345_p1 = scmp.ge.s32.totalorder %s445_s9, 2  ;;  %s280_s25 = sand.u32 1, %s433_s6  }
 0x394   : > { %s281_s26 = scalar_lea.sflag [#allocation3], %s280_s25 }
 0x395   : > { %p342_p2 = pnand %p345_p1, %p504_p6 }
 0x397   : > { %428 = dma.done.wait (!%p342_p2), %s281_s26, 16  }
 0x398   : > { %430 = vsyncadd (!%p342_p2), %s281_s26, 4294967280  ;;  %p11_p3 = scmp.ge.s32.totalorder %s487_s12, 4   ;;  %s575_s6 = smov %s437_s7 }
 0x399   : > { %s576_s7 = smov %s441_s8  ;;  %s577_s8 = smov %s498_s15 }
 0x39a   : > { %s578_s9 = smov %s487_s12  ;;  %13 = sbr.rel (!%p11_p3) target bundleno = 3 (0x3), region = 59 }
 0x3a1   :  { %285 = vsyncpa [#allocation3], 1 }
 0x3a2   :  { %287 = vsyncpa [#allocation3 + $0x1], 1 }

</bundles_post_ra>
